<compile_context>
chip_gen: v7x
topology: tpu7x:2x2x1
jax: 0.10.0
libtpu: 0.0.40
codegen_flags: <defaults>
</compile_context>

<pallas_src>
import functools

import jax
import jax.numpy as jnp
import numpy as np
from jax.experimental import pallas as pl
from jax.experimental.pallas import tpu as pltpu

_LANES = 128


def _round_up(n, m):
    return ((n + m - 1) // m) * m


def _pad_axis(x, axis, size):
    pad = size - x.shape[axis]
    if pad == 0:
        return x
    widths = [(0, 0)] * x.ndim
    widths[axis] = (0, pad)
    return jnp.pad(x, widths)


def rgcn_fused_kernel(a_ref, xw_ref, x_ref, wloop_ref, bias_ref,
                      wlin_ref, blin_ref, out_ref, pred_ref):
    """One destination-node tile per grid step (single 'parallel' grid axis).

    a_ref   : (TV, R*N)   flattened per-relation adjacency rows (dst tile)
    xw_ref  : (R*N, Dp)   stacked per-relation transforms X @ W_r
    x_ref   : (TV, Dp)    node features for the self-loop term
    """
    # Deep-K relation aggregation + self-loop + bias, all in one step.
    h = (jnp.dot(a_ref[...], xw_ref[...], preferred_element_type=jnp.float32)
         + jnp.dot(x_ref[...], wloop_ref[...],
                   preferred_element_type=jnp.float32)
         + bias_ref[...])
    out_ref[...] = h.astype(out_ref.dtype)
    # Supervised linear head consumes h directly (no extra scratch / copies).
    pred_ref[...] = (
        jnp.dot(h, wlin_ref[...], preferred_element_type=jnp.float32)
        + blin_ref[...]).astype(pred_ref.dtype)


@functools.partial(jax.jit, static_argnames=("matmul_dtype", "tile_v"))
def train_model_forward(node_attri, node_ids, adj, w_comp, basis, w_loop,
                        bias, w_lin, b_lin, *, matmul_dtype=jnp.float32,
                        tile_v=None):
    R, N, _ = adj.shape
    D = node_attri.shape[1]
    L = w_lin.shape[1]
    Dp = _round_up(D, _LANES)   # lane-dense feature axis
    Lp = _round_up(L, _LANES)   # lane-dense label axis

    if tile_v is None:
        tile_v = min(N, 256)    # small enough for v7x's scoped-VMEM budget
    assert N % tile_v == 0, "N must be divisible by the node tile size"

    # --- EmbeddingLayerAttri.forward: pretrained-attribute lookup (XLA glue) ---
    ids = jnp.reshape(node_ids, (-1,))                     # h.squeeze()
    x = jnp.take(node_attri, ids, axis=0)                  # (N, D)

    # --- Basis decomposition and stacked per-relation transforms ---
    rel_w = jnp.einsum('rb,bio->rio', w_comp, basis)       # (R, D, D)
    xw = jnp.einsum('nd,rde->rne', x, rel_w).reshape(R * N, D)   # (R*N, D)

    # Flatten the per-relation adjacency into one deep contraction axis:
    # A_flat[v, r*N + u] = adj[r, v, u]
    a_flat = jnp.transpose(adj, (1, 0, 2)).reshape(N, R * N)

    # --- Lane-density padding (zero columns -> math unchanged) ---
    x_p = _pad_axis(x, 1, Dp)
    xw_p = _pad_axis(xw, 1, Dp)
    wloop_p = _pad_axis(_pad_axis(w_loop, 0, Dp), 1, Dp)
    bias_p = _pad_axis(bias, 1, Dp)
    wlin_p = _pad_axis(_pad_axis(w_lin, 0, Dp), 1, Lp)
    blin_p = _pad_axis(b_lin, 1, Lp)

    # Optionally stream the two large operands in bf16 (f32 MXU accumulation).
    a_flat = a_flat.astype(matmul_dtype)
    xw_p = xw_p.astype(matmul_dtype)

    nv = N // tile_v
    out_p, pred_p = pl.pallas_call(
        rgcn_fused_kernel,
        out_shape=(
            jax.ShapeDtypeStruct((N, Dp), jnp.float32),
            jax.ShapeDtypeStruct((N, Lp), jnp.float32),
        ),
        grid=(nv,),
        in_specs=[
            pl.BlockSpec((tile_v, R * N), lambda i: (i, 0)),   # A_flat tile
            pl.BlockSpec((R * N, Dp), lambda i: (0, 0)),       # XW stack
            pl.BlockSpec((tile_v, Dp), lambda i: (i, 0)),      # x tile
            pl.BlockSpec((Dp, Dp), lambda i: (0, 0)),          # W_loop
            pl.BlockSpec((1, Dp), lambda i: (0, 0)),           # bias
            pl.BlockSpec((Dp, Lp), lambda i: (0, 0)),          # W_lin
            pl.BlockSpec((1, Lp), lambda i: (0, 0)),           # b_lin
        ],
        out_specs=(
            pl.BlockSpec((tile_v, Dp), lambda i: (i, 0)),      # out (RGCN h)
            pl.BlockSpec((tile_v, Lp), lambda i: (i, 0)),      # pred (logits)
        ),
        compiler_params=pltpu.CompilerParams(
            dimension_semantics=("parallel",)),
    )(a_flat, xw_p, x_p, wloop_p, bias_p, wlin_p, blin_p)

    # Strip the lane padding back off.
    return out_p[:, :D], pred_p[:, :L]


def reference_forward(node_attri, node_ids, adj, w_comp, basis, w_loop, bias,
                      w_lin, b_lin):
    """Pure-JAX dense reference of the same forward pass (f32 throughout)."""
    x = node_attri[jnp.reshape(node_ids, (-1,))]
    rel_w = jnp.einsum('rb,bio->rio', w_comp, basis)
    xw = jnp.einsum('nd,rde->rne', x, rel_w)
    agg = jnp.einsum('rvn,rne->ve', adj, xw)
    out = agg + bias + x @ w_loop
    pred = out @ w_lin + b_lin
    return out, pred


if __name__ == "__main__":
    # Small TPU-friendly synthetic config consistent with TrainModel.__init__
    # when node_attri is given (EmbeddingLayerAttri), num_hidden_layers=1
    # (single RelGraphConv, no activation), supervised head with nlabel=4.
    num_nodes = 64
    attri_dim = 32
    num_rels = 3
    R = num_rels * 2           # directed relation types inside the RGCN
    num_bases = 2
    nlabel = 4
    num_edges = 256

    key = jax.random.PRNGKey(0)
    keys = jax.random.split(key, 10)

    # Pretrained node attributes (the EmbeddingLayerAttri table) + parameters.
    node_attri = jax.random.normal(keys[0], (num_nodes, attri_dim),
                                   jnp.float32) * 0.1
    basis = jax.random.normal(keys[1], (num_bases, attri_dim, attri_dim),
                              jnp.float32) * (1.0 / np.sqrt(attri_dim))
    w_comp = jax.random.normal(keys[2], (R, num_bases), jnp.float32)
    w_loop = jax.random.normal(keys[3], (attri_dim, attri_dim),
                               jnp.float32) * (1.0 / np.sqrt(attri_dim))
    bias = jnp.zeros((1, attri_dim), jnp.float32)
    w_lin = jax.random.normal(keys[4], (attri_dim, nlabel),
                              jnp.float32) * (1.0 / np.sqrt(attri_dim))
    b_lin = jnp.zeros((1, nlabel), jnp.float32)

    # Synthetic graph: (src, dst, rel_type, norm) per edge — the (g, r, norm)
    # arguments of TrainModel.forward; `h` is the node-id column vector.
    src = jax.random.randint(keys[5], (num_edges,), 0, num_nodes)
    dst = jax.random.randint(keys[6], (num_edges,), 0, num_nodes)
    rel = jax.random.randint(keys[7], (num_edges,), 0, R)
    norm = jax.random.uniform(keys[8], (num_edges,), jnp.float32,
                              minval=0.1, maxval=1.0)
    node_ids = jnp.arange(num_nodes, dtype=jnp.int32).reshape(num_nodes, 1)

    # Dense per-relation adjacency A_r[v, u] = sum of norm over edges u -> v.
    adj = jnp.zeros((R, num_nodes, num_nodes), jnp.float32)
    adj = adj.at[rel, dst, src].add(norm)

    # --- Pallas hot path: f32 (exact module semantics) ---
    out, pred = train_model_forward(node_attri, node_ids, adj, w_comp, basis,
                                    w_loop, bias, w_lin, b_lin)
    jax.block_until_ready(out)
    jax.block_until_ready(pred)

    ref_out, ref_pred = reference_forward(node_attri, node_ids, adj, w_comp,
                                          basis, w_loop, bias, w_lin, b_lin)
    np.testing.assert_allclose(np.asarray(out), np.asarray(ref_out),
                               rtol=1e-4, atol=1e-4)
    np.testing.assert_allclose(np.asarray(pred), np.asarray(ref_pred),
                               rtol=1e-4, atol=1e-4)

    # --- bf16-streamed variant (halves HBM bytes for A / XW at scale) ---
    out_bf, pred_bf = train_model_forward(node_attri, node_ids, adj, w_comp,
                                          basis, w_loop, bias, w_lin, b_lin,
                                          matmul_dtype=jnp.bfloat16)
    jax.block_until_ready(out_bf)
    jax.block_until_ready(pred_bf)
    np.testing.assert_allclose(np.asarray(out_bf), np.asarray(ref_out),
                               rtol=5e-2, atol=5e-2)
    np.testing.assert_allclose(np.asarray(pred_bf), np.asarray(ref_pred),
                               rtol=5e-2, atol=5e-2)

    print("KERNEL_OK")
</pallas_src>

<mosaic_0001>
module attributes {stable_mosaic.version = 11 : i64} {
  func.func @rgcn_fused_kernel(%arg0: i32, %arg1: memref<64x384xf32, #tpu.memory_space<vmem>>, %arg2: memref<384x128xf32, #tpu.memory_space<vmem>>, %arg3: memref<64x128xf32, #tpu.memory_space<vmem>>, %arg4: memref<128x128xf32, #tpu.memory_space<vmem>>, %arg5: memref<1x128xf32, #tpu.memory_space<vmem>>, %arg6: memref<128x128xf32, #tpu.memory_space<vmem>>, %arg7: memref<1x128xf32, #tpu.memory_space<vmem>>, %arg8: memref<64x128xf32, #tpu.memory_space<vmem>>, %arg9: memref<64x128xf32, #tpu.memory_space<vmem>>) attributes {dimension_semantics = [#tpu.dimension_semantics<parallel>], iteration_bounds = array<i64: 1>, scalar_prefetch = 0 : i64, scratch_operands = 0 : i64, tpu.core_type = #tpu.core_type<tc>, window_params = [{transform_indices = @transform_0, window_bounds = array<i64: 64, 384>}, {pipeline_mode = #tpu.pipeline_mode<synchronous>, transform_indices = @transform_1, window_bounds = array<i64: 384, 128>}, {transform_indices = @transform_2, window_bounds = array<i64: 64, 128>}, {pipeline_mode = #tpu.pipeline_mode<synchronous>, transform_indices = @transform_3, window_bounds = array<i64: 128, 128>}, {pipeline_mode = #tpu.pipeline_mode<synchronous>, transform_indices = @transform_4, window_bounds = array<i64: 1, 128>}, {pipeline_mode = #tpu.pipeline_mode<synchronous>, transform_indices = @transform_5, window_bounds = array<i64: 128, 128>}, {pipeline_mode = #tpu.pipeline_mode<synchronous>, transform_indices = @transform_6, window_bounds = array<i64: 1, 128>}, {transform_indices = @transform_7, window_bounds = array<i64: 64, 128>}, {transform_indices = @transform_8, window_bounds = array<i64: 64, 128>}]} {
    %c0 = arith.constant 0 : index
    %c0_0 = arith.constant 0 : index
    %0 = vector.load %arg1[%c0, %c0_0] : memref<64x384xf32, #tpu.memory_space<vmem>>, vector<64x384xf32>
    %c0_1 = arith.constant 0 : index
    %c0_2 = arith.constant 0 : index
    %1 = vector.load %arg2[%c0_1, %c0_2] : memref<384x128xf32, #tpu.memory_space<vmem>>, vector<384x128xf32>
    %cst = arith.constant dense<0.000000e+00> : vector<64x128xf32>
    %2 = tpu.matmul %0, %1, %cst {dimension_numbers = #tpu.dot_dimension_numbers<[1], [0], [0], [1], [0, 0, 1, 1], [], []>} : vector<64x384xf32>, vector<384x128xf32>, vector<64x128xf32> -> vector<64x128xf32>
    %c0_3 = arith.constant 0 : index
    %c0_4 = arith.constant 0 : index
    %3 = vector.load %arg3[%c0_3, %c0_4] : memref<64x128xf32, #tpu.memory_space<vmem>>, vector<64x128xf32>
    %c0_5 = arith.constant 0 : index
    %c0_6 = arith.constant 0 : index
    %4 = vector.load %arg4[%c0_5, %c0_6] : memref<128x128xf32, #tpu.memory_space<vmem>>, vector<128x128xf32>
    %cst_7 = arith.constant dense<0.000000e+00> : vector<64x128xf32>
    %5 = tpu.matmul %3, %4, %cst_7 {dimension_numbers = #tpu.dot_dimension_numbers<[1], [0], [0], [1], [0, 0, 1, 1], [], []>} : vector<64x128xf32>, vector<128x128xf32>, vector<64x128xf32> -> vector<64x128xf32>
    %6 = arith.addf %2, %5 : vector<64x128xf32>
    %c0_8 = arith.constant 0 : index
    %c0_9 = arith.constant 0 : index
    %7 = vector.load %arg5[%c0_8, %c0_9] : memref<1x128xf32, #tpu.memory_space<vmem>>, vector<1x128xf32>
    %8 = vector.broadcast %7 : vector<1x128xf32> to vector<64x128xf32>
    %9 = arith.addf %6, %8 : vector<64x128xf32>
    %c0_10 = arith.constant 0 : index
    %c0_11 = arith.constant 0 : index
    %10 = vector.load %arg8[%c0_10, %c0_11] : memref<64x128xf32, #tpu.memory_space<vmem>>, vector<64x128xf32>
    tpu.vector_store %arg8[%c0_10, %c0_11], %9 {strides = array<i32>} : memref<64x128xf32, #tpu.memory_space<vmem>>, vector<64x128xf32>,
    %c0_12 = arith.constant 0 : index
    %c0_13 = arith.constant 0 : index
    %11 = vector.load %arg6[%c0_12, %c0_13] : memref<128x128xf32, #tpu.memory_space<vmem>>, vector<128x128xf32>
    %cst_14 = arith.constant dense<0.000000e+00> : vector<64x128xf32>
    %12 = tpu.matmul %9, %11, %cst_14 {dimension_numbers = #tpu.dot_dimension_numbers<[1], [0], [0], [1], [0, 0, 1, 1], [], []>} : vector<64x128xf32>, vector<128x128xf32>, vector<64x128xf32> -> vector<64x128xf32>
    %c0_15 = arith.constant 0 : index
    %c0_16 = arith.constant 0 : index
    %13 = vector.load %arg7[%c0_15, %c0_16] : memref<1x128xf32, #tpu.memory_space<vmem>>, vector<1x128xf32>
    %14 = vector.broadcast %13 : vector<1x128xf32> to vector<64x128xf32>
    %15 = arith.addf %12, %14 : vector<64x128xf32>
    %c0_17 = arith.constant 0 : index
    %c0_18 = arith.constant 0 : index
    %16 = vector.load %arg9[%c0_17, %c0_18] : memref<64x128xf32, #tpu.memory_space<vmem>>, vector<64x128xf32>
    tpu.vector_store %arg9[%c0_17, %c0_18], %15 {strides = array<i32>} : memref<64x128xf32, #tpu.memory_space<vmem>>, vector<64x128xf32>,
    return
  }
  func.func @transform_0(%arg0: i32) -> (i32, i32) {
    %c0_i32 = arith.constant 0 : i32
    %c0_i32_0 = arith.constant 0 : i32
    return %arg0, %c0_i32 : i32, i32
  }
  func.func @transform_1(%arg0: i32) -> (i32, i32) {
    %c0_i32 = arith.constant 0 : i32
    %c0_i32_0 = arith.constant 0 : i32
    %c0_i32_1 = arith.constant 0 : i32
    return %c0_i32, %c0_i32_0 : i32, i32
  }
  func.func @transform_2(%arg0: i32) -> (i32, i32) {
    %c0_i32 = arith.constant 0 : i32
    %c0_i32_0 = arith.constant 0 : i32
    return %arg0, %c0_i32 : i32, i32
  }
  func.func @transform_3(%arg0: i32) -> (i32, i32) {
    %c0_i32 = arith.constant 0 : i32
    %c0_i32_0 = arith.constant 0 : i32
    %c0_i32_1 = arith.constant 0 : i32
    return %c0_i32, %c0_i32_0 : i32, i32
  }
  func.func @transform_4(%arg0: i32) -> (i32, i32) {
    %c0_i32 = arith.constant 0 : i32
    %c0_i32_0 = arith.constant 0 : i32
    %c0_i32_1 = arith.constant 0 : i32
    return %c0_i32, %c0_i32_0 : i32, i32
  }
  func.func @transform_5(%arg0: i32) -> (i32, i32) {
    %c0_i32 = arith.constant 0 : i32
    %c0_i32_0 = arith.constant 0 : i32
    %c0_i32_1 = arith.constant 0 : i32
    return %c0_i32, %c0_i32_0 : i32, i32
  }
  func.func @transform_6(%arg0: i32) -> (i32, i32) {
    %c0_i32 = arith.constant 0 : i32
    %c0_i32_0 = arith.constant 0 : i32
    %c0_i32_1 = arith.constant 0 : i32
    return %c0_i32, %c0_i32_0 : i32, i32
  }
  func.func @transform_7(%arg0: i32) -> (i32, i32) {
    %c0_i32 = arith.constant 0 : i32
    %c0_i32_0 = arith.constant 0 : i32
    return %arg0, %c0_i32 : i32, i32
  }
  func.func @transform_8(%arg0: i32) -> (i32, i32) {
    %c0_i32 = arith.constant 0 : i32
    %c0_i32_0 = arith.constant 0 : i32
    return %arg0, %c0_i32 : i32, i32
  }
}

</mosaic_0001>

<bundles_post_ra>
// kernel: train_model_forward.1
= control target key start
LH: loop header
LB: loop body
LE: loop exit
PB: predicated region body
PF: predicated region fallthrough
CT: control target
= control target key end

     0   :  { %s1447_s3 = inlined_call_operand.vmem [shape: f32[128,128], index: 3, kind: input, shape index: {}]   ;;  %s1448_s1 = inlined_call_operand.vmem [shape: f32[384,128], index: 1, kind: input, shape index: {}]   ;;  %s1449_s2 = inlined_call_operand.vmem [shape: f32[64,128], index: 2, kind: input, shape index: {}]   ;;  %s1450_s0 = inlined_call_operand.vmem [shape: f32[64,384], index: 0, kind: input, shape index: {}]   ;;  %s1451_s5 = inlined_call_operand.vmem [shape: f32[128,128], index: 5, kind: input, shape index: {}]   ;;  %s1452_s4 = inlined_call_operand.vmem [shape: f32[1,128], index: 4, kind: input, shape index: {}]   ;;  %s1453_s7 = inlined_call_operand.vmem [shape: f32[64,128], index: 7, kind: output, shape index: {0}]   ;;  %s1454_s6 = inlined_call_operand.vmem [shape: f32[1,128], index: 6, kind: input, shape index: {}]   ;;  %s1455_s8 = inlined_call_operand.vmem [shape: f32[64,128], index: 8, kind: output, shape index: {1}]  }
   0x1   :  { %v108_v0 = vld [vmem:[%s1447_s3] sm:$0xff]  ;;  %v109_v1 = vld [vmem:[%s1447_s3 + $0x8] sm:$0xff]  ;;  %v110_v2 = vld [vmem:[%s1447_s3 + $0x10] sm:$0xff] }
   0x2   :  { %v868_v3 = vpack.c.bf16 %v109_v1, %v108_v0  ;;  %v111_v4 = vld [vmem:[%s1447_s3 + $0x18] sm:$0xff]  ;;  %v112_v6 = vld [vmem:[%s1447_s3 + $0x20] sm:$0xff]  ;;  %v113_v7 = vld [vmem:[%s1447_s3 + $0x28] sm:$0xff] }
   0x3   :  { %v872_v5 = vpack.c.bf16 %v111_v4, %v110_v2  ;;  %v68_v8 = vld [vmem:[%s1448_s1 + $0x80] sm:$0xff]  ;;  %v69_v9 = vld [vmem:[%s1448_s1 + $0x88] sm:$0xff]  ;;  %v70_v14 = vld [vmem:[%s1448_s1 + $0x90] sm:$0xff]  ;;  %v876_v15 = vpack.c.bf16 %v113_v7, %v112_v6 }
   0x4   :  { %869 = vmatprep.subr.bf16.mxu0 %v868_v3  ;;  %v52_v10 = vld [vmem:[%s1448_s1] sm:$0xff]  ;;  %v53_v11 = vld [vmem:[%s1448_s1 + $0x8] sm:$0xff]  ;;  %v900_v12 = vpack.c.bf16 %v69_v9, %v68_v8  ;;  %v71_v16 = vld [vmem:[%s1448_s1 + $0x98] sm:$0xff] }
   0x5   :  { %871 = vmatpush3.bf16.msra.mxu0 %v868_v3  ;;  %v902_v13 = vpack.c.bf16 %v53_v11, %v52_v10  ;;  %v54_v17 = vld [vmem:[%s1448_s1 + $0x10] sm:$0xff]  ;;  %v55_v18 = vld [vmem:[%s1448_s1 + $0x18] sm:$0xff]  ;;  %v904_v21 = vpack.c.bf16 %v71_v16, %v70_v14  ;;  %v72_v22 = vld [vmem:[%s1448_s1 + $0xa0] sm:$0xff] }
   0x6   :  { %873 = vmatprep.subr.bf16.mxu0 %v872_v5  ;;  %v114_v19 = vld [vmem:[%s1447_s3 + $0x30] sm:$0xff]  ;;  %v115_v20 = vld [vmem:[%s1447_s3 + $0x38] sm:$0xff]  ;;  %901 = vmatprep.subr.bf16.mxu1 %v900_v12  ;;  %v906_v23 = vpack.c.bf16 %v55_v18, %v54_v17  ;;  %v73_v24 = vld [vmem:[%s1448_s1 + $0xa8] sm:$0xff] }
   0x7   :  { %903 = vmatpush3.bf16.msra.mxu1 %v902_v13  ;;  %v908_v25 = vpack.c.bf16 %v73_v24, %v72_v22  ;;  %v56_v26 = vld [vmem:[%s1448_s1 + $0x20] sm:$0xff]  ;;  %v57_v27 = vld [vmem:[%s1448_s1 + $0x28] sm:$0xff]  ;;  %v880_v28 = vpack.c.bf16 %v115_v20, %v114_v19  ;;  %v74_v29 = vld [vmem:[%s1448_s1 + $0xb0] sm:$0xff] }
   0x8   :  { %905 = vmatprep.subr.bf16.mxu1 %v904_v21  ;;  %v75_v30 = vld [vmem:[%s1448_s1 + $0xb8] sm:$0xff]  ;;  %v116_v31 = vld [vmem:[%s1447_s3 + $0x40] sm:$0xff]  ;;  %v117_v32 = vld [vmem:[%s1447_s3 + $0x48] sm:$0xff]  ;;  %v910_v33 = vpack.c.bf16 %v57_v27, %v56_v26 }
   0x9   :  { %875 = vmatpush3.bf16.msra.mxu0 %v872_v5  ;;  %v912_v34 = vpack.c.bf16 %v75_v30, %v74_v29  ;;  %v58_v35 = vld [vmem:[%s1448_s1 + $0x30] sm:$0xff]  ;;  %v59_v36 = vld [vmem:[%s1448_s1 + $0x38] sm:$0xff]  ;;  %v100_v37 = vld [vmem:[%s1449_s2] sm:$0xff]  ;;  %v884_v38 = vpack.c.bf16 %v117_v32, %v116_v31 }
   0xa   :  { %877 = vmatprep.subr.bf16.mxu0 %v876_v15  ;;  %v76_v39 = vld [vmem:[%s1448_s1 + $0xc0] sm:$0xff]  ;;  %v77_v40 = vld [vmem:[%s1448_s1 + $0xc8] sm:$0xff]  ;;  %768 = vmatprep.mubr.f32.mxu0 %v100_v37  ;;  %v118_v41 = vld [vmem:[%s1447_s3 + $0x50] sm:$0xff]  ;;  %v914_v43 = vpack.c.bf16 %v59_v36, %v58_v35 }
   0xb   :  { %907 = vmatpush3.bf16.msra.mxu1 %v906_v23  ;;  %v119_v42 = vld [vmem:[%s1447_s3 + $0x58] sm:$0xff]  ;;  %v916_v44 = vpack.c.bf16 %v77_v40, %v76_v39  ;;  %v60_v45 = vld [vmem:[%s1448_s1 + $0x40] sm:$0xff]  ;;  %v61_v46 = vld [vmem:[%s1448_s1 + $0x48] sm:$0xff] }
   0xc   :  { %909 = vmatprep.subr.bf16.mxu1 %v908_v25  ;;  %v888_v47 = vpack.c.bf16 %v119_v42, %v118_v41  ;;  %v78_v48 = vld [vmem:[%s1448_s1 + $0xd0] sm:$0xff]  ;;  %v79_v49 = vld [vmem:[%s1448_s1 + $0xd8] sm:$0xff]  ;;  %v120_v50 = vld [vmem:[%s1447_s3 + $0x60] sm:$0xff]  ;;  %v918_v53 = vpack.c.bf16 %v61_v46, %v60_v45 }
   0xd   :  { %879 = vmatpush3.bf16.msra.mxu0 %v876_v15  ;;  %v121_v51 = vld [vmem:[%s1447_s3 + $0x68] sm:$0xff]  ;;  %v920_v54 = vpack.c.bf16 %v79_v49, %v78_v48  ;;  %v62_v55 = vld [vmem:[%s1448_s1 + $0x50] sm:$0xff]  ;;  %v63_v56 = vld [vmem:[%s1448_s1 + $0x58] sm:$0xff] }
   0xe   :  { %881 = vmatprep.subr.bf16.mxu0 %v880_v28  ;;  %v29_v52 = vld [vmem:[%s1450_s0 + $0x8] sm:$0xff]  ;;  %v892_v57 = vpack.c.bf16 %v121_v51, %v120_v50  ;;  %v80_v58 = vld [vmem:[%s1448_s1 + $0xe0] sm:$0xff]  ;;  %v122_v60 = vld [vmem:[%s1447_s3 + $0x70] sm:$0xff]  ;;  %v922_v62 = vpack.c.bf16 %v63_v56, %v62_v55 }
   0xf   :  { %911 = vmatpush3.bf16.msra.mxu1 %v910_v33  ;;  %293 = vmatprep.mubr.f32.mxu1 %v29_v52  ;;  %v81_v59 = vld [vmem:[%s1448_s1 + $0xe8] sm:$0xff]  ;;  %v123_v61 = vld [vmem:[%s1447_s3 + $0x78] sm:$0xff]  ;;  %v64_v0 = vld [vmem:[%s1448_s1 + $0x60] sm:$0xff] }
  0x10   :  { %913 = vmatprep.subr.bf16.mxu1 %v912_v34  ;;  %v924_v63 = vpack.c.bf16 %v81_v59, %v80_v58  ;;  %v65_v1 = vld [vmem:[%s1448_s1 + $0x68] sm:$0xff]  ;;  %v896_v2 = vpack.c.bf16 %v123_v61, %v122_v60  ;;  %v82_v3 = vld [vmem:[%s1448_s1 + $0xf0] sm:$0xff]  ;;  %v83_v4 = vld [vmem:[%s1448_s1 + $0xf8] sm:$0xff] }
  0x11   :  { %883 = vmatpush3.bf16.msra.mxu0 %v880_v28  ;;  %v84_v5 = vld [vmem:[%s1448_s1 + $0x100] sm:$0xff]  ;;  %v85_v6 = vld [vmem:[%s1448_s1 + $0x108] sm:$0xff]  ;;  %v926_v7 = vpack.c.bf16 %v65_v1, %v64_v0  ;;  %v928_v8 = vpack.c.bf16 %v83_v4, %v82_v3  ;;  %v66_v9 = vld [vmem:[%s1448_s1 + $0x70] sm:$0xff] }
  0x12   :  { %885 = vmatprep.subr.bf16.mxu0 %v884_v38  ;;  %v67_v10 = vld [vmem:[%s1448_s1 + $0x78] sm:$0xff]  ;;  %v932_v11 = vpack.c.bf16 %v85_v6, %v84_v5  ;;  %v86_v12 = vld [vmem:[%s1448_s1 + $0x110] sm:$0xff]  ;;  %v101_v15 = vld [vmem:[%s1449_s2 + $0x8] sm:$0xff] }
  0x13   :  { %915 = vmatpush3.bf16.msra.mxu1 %v914_v43  ;;  %v87_v13 = vld [vmem:[%s1448_s1 + $0x118] sm:$0xff]  ;;  %v930_v14 = vpack.c.bf16 %v67_v10, %v66_v9  ;;  %v462_v16 = vld [vmem:[%s1451_s5] sm:$0xff]  ;;  %v463_v17 = vld [vmem:[%s1451_s5 + $0x8] sm:$0xff] }
  0x14   :  { %917 = vmatprep.subr.bf16.mxu1 %v916_v44  ;;  %v936_v18 = vpack.c.bf16 %v87_v13, %v86_v12  ;;  %v102_v19 = vld [vmem:[%s1449_s2 + $0x10] sm:$0xff]  ;;  %v964_v20 = vpack.c.bf16 %v463_v17, %v462_v16  ;;  %v88_v21 = vld [vmem:[%s1448_s1 + $0x120] sm:$0xff]  ;;  %v89_v22 = vld [vmem:[%s1448_s1 + $0x128] sm:$0xff] }
  0x15   :  { %887 = vmatpush3.bf16.msra.mxu0 %v884_v38  ;;  %v28_v23 = vld [vmem:[%s1450_s0] sm:$0xff]  ;;  %v464_v24 = vld [vmem:[%s1451_s5 + $0x10] sm:$0xff]  ;;  %v465_v25 = vld [vmem:[%s1451_s5 + $0x18] sm:$0xff]  ;;  %v940_v28 = vpack.c.bf16 %v89_v22, %v88_v21 }
  0x16   :  { %889 = vmatprep.subr.bf16.mxu0 %v888_v47  ;;  %v32_v26 = vld [vmem:[%s1450_s0 + $0x20] sm:$0xff]  ;;  %v103_v27 = vld [vmem:[%s1449_s2 + $0x18] sm:$0xff]  ;;  %v90_v30 = vld [vmem:[%s1448_s1 + $0x130] sm:$0xff]  ;;  %v968_v32 = vpack.c.bf16 %v465_v25, %v464_v24 }
  0x17   :  { %919 = vmatpush3.bf16.msra.mxu1 %v918_v53  ;;  %v104_v29 = vld [vmem:[%s1449_s2 + $0x20] sm:$0xff]  ;;  %v91_v31 = vld [vmem:[%s1448_s1 + $0x138] sm:$0xff]  ;;  %v105_v35 = vld [vmem:[%s1449_s2 + $0x28] sm:$0xff] }
  0x18   :  { %921 = vmatprep.subr.bf16.mxu1 %v920_v54  ;;  %v31_v33 = vld [vmem:[%s1450_s0 + $0x18] sm:$0xff]  ;;  %v944_v36 = vpack.c.bf16 %v91_v31, %v90_v30  ;;  %v106_v37 = vld [vmem:[%s1449_s2 + $0x30] sm:$0xff]  ;;  %v92_v38 = vld [vmem:[%s1448_s1 + $0x140] sm:$0xff] }
  0x19   :  { %891 = vmatpush3.bf16.msra.mxu0 %v888_v47  ;;  %v35_v34 = vld [vmem:[%s1450_s0 + $0x38] sm:$0xff]  ;;  %v93_v39 = vld [vmem:[%s1448_s1 + $0x148] sm:$0xff]  ;;  %v34_v40 = vld [vmem:[%s1450_s0 + $0x30] sm:$0xff] }
  0x1a   :  { %893 = vmatprep.subr.bf16.mxu0 %v892_v57  ;;  %v38_v41 = vld [vmem:[%s1450_s0 + $0x50] sm:$0xff]  ;;  %v107_v42 = vld [vmem:[%s1449_s2 + $0x38] sm:$0xff]  ;;  %v948_v43 = vpack.c.bf16 %v93_v39, %v92_v38  ;;  %v37_v47 = vld [vmem:[%s1450_s0 + $0x48] sm:$0xff] }
  0x1b   :  { %923 = vmatpush3.bf16.msra.mxu1 %v922_v62  ;;  %v30_v44 = vld [vmem:[%s1450_s0 + $0x10] sm:$0xff]  ;;  %v95_v46 = vld [vmem:[%s1448_s1 + $0x158] sm:$0xff]  ;;  %v41_v48 = vld [vmem:[%s1450_s0 + $0x68] sm:$0xff] }
  0x1c   :  { %925 = vmatprep.subr.bf16.mxu1 %v924_v63  ;;  %v94_v45 = vld [vmem:[%s1448_s1 + $0x150] sm:$0xff]  ;;  %v96_v50 = vld [vmem:[%s1448_s1 + $0x160] sm:$0xff]  ;;  %v97_v51 = vld [vmem:[%s1448_s1 + $0x168] sm:$0xff] }
  0x1d   :  { %895 = vmatpush3.bf16.msra.mxu0 %v892_v57  ;;  %v952_v49 = vpack.c.bf16 %v95_v46, %v94_v45  ;;  %v40_v52 = vld [vmem:[%s1450_s0 + $0x60] sm:$0xff]  ;;  %v956_v54 = vpack.c.bf16 %v97_v51, %v96_v50  ;;  %v98_v55 = vld [vmem:[%s1448_s1 + $0x170] sm:$0xff]  ;;  %v99_v56 = vld [vmem:[%s1448_s1 + $0x178] sm:$0xff] }
  0x1e   :  { %897 = vmatprep.subr.bf16.mxu0 %v896_v2  ;;  %v44_v53 = vld [vmem:[%s1450_s0 + $0x80] sm:$0xff]  ;;  %v43_v57 = vld [vmem:[%s1450_s0 + $0x78] sm:$0xff]  ;;  %v960_v59 = vpack.c.bf16 %v99_v56, %v98_v55  ;;  %v46_v60 = vld [vmem:[%s1450_s0 + $0x90] sm:$0xff] }
  0x1f   :  { %927 = vmatpush3.bf16.msra.mxu1 %v926_v7  ;;  %v47_v58 = vld [vmem:[%s1450_s0 + $0x98] sm:$0xff]  ;;  %v50_v61 = vld [vmem:[%s1450_s0 + $0xb0] sm:$0xff]  ;;  %v49_v62 = vld [vmem:[%s1450_s0 + $0xa8] sm:$0xff] }
  0x20   :  { %929 = vmatprep.subr.bf16.mxu1 %v928_v8  ;;  %v33_v63 = vld [vmem:[%s1450_s0 + $0x28] sm:$0xff]  ;;  %v36_v0 = vld [vmem:[%s1450_s0 + $0x40] sm:$0xff]  ;;  %v39_v1 = vld [vmem:[%s1450_s0 + $0x58] sm:$0xff] }
  0x21   :  { %899 = vmatpush3.bf16.msra.mxu0 %v896_v2  ;;  %v42_v2 = vld [vmem:[%s1450_s0 + $0x70] sm:$0xff]  ;;  %v45_v3 = vld [vmem:[%s1450_s0 + $0x88] sm:$0xff]  ;;  %v48_v4 = vld [vmem:[%s1450_s0 + $0xa0] sm:$0xff] }
  0x22   :  { %933 = vmatprep.subr.bf16.mxu0 %v932_v11  ;;  %v51_v5 = vld [vmem:[%s1450_s0 + $0xb8] sm:$0xff]  ;;  %v466_v6 = vld [vmem:[%s1451_s5 + $0x20] sm:$0xff]  ;;  %v467_v7 = vld [vmem:[%s1451_s5 + $0x28] sm:$0xff] }
  0x23   :  { %931 = vmatpush3.bf16.msra.mxu1 %v930_v14  ;;  %v972_v8 = vpack.c.bf16 %v467_v7, %v466_v6  ;;  %v468_v9 = vld [vmem:[%s1451_s5 + $0x30] sm:$0xff]  ;;  %v469_v10 = vld [vmem:[%s1451_s5 + $0x38] sm:$0xff]  ;;  %v470_v12 = vld [vmem:[%s1451_s5 + $0x40] sm:$0xff] }
  0x24   :  { %769 = vmatmul.mubr.f32.vlgmr.msra.gmra.mrb[0].mxu0 %v101_v15  ;;  %965 = vmatprep.subr.bf16.mxu1 %v964_v20  ;;  %v471_v13 = vld [vmem:[%s1451_s5 + $0x48] sm:$0xff]  ;;  %v472_v15 = vld [vmem:[%s1451_s5 + $0x50] sm:$0xff]  ;;  %v473_v16 = vld [vmem:[%s1451_s5 + $0x58] sm:$0xff] }
  0x25   :  { %935 = vmatpush3.bf16.msra.mxu0 %v932_v11  ;;  %771 = vmatprep.mubr.f32.mxu0 %v102_v19  ;;  %v976_v11 = vpack.c.bf16 %v469_v10, %v468_v9  ;;  %v980_v14 = vpack.c.bf16 %v471_v13, %v470_v12  ;;  %v984_v17 = vpack.c.bf16 %v473_v16, %v472_v15  ;;  %v475_v19 = vld [vmem:[%s1451_s5 + $0x68] sm:$0xff]  ;;  %v476_v21 = vld [vmem:[%s1451_s5 + $0x70] sm:$0xff]  ;;  %v477_v22 = vld [vmem:[%s1451_s5 + $0x78] sm:$0xff] }
  0x26   :  { %937 = vmatprep.subr.bf16.mxu0 %v936_v18  ;;  %294 = vmatmul.mubr.f32.vlgmr.msra.gmra.mrb[0].mxu1 %v28_v23  ;;  %v992_v23 = vpack.c.bf16 %v477_v22, %v476_v21  ;;  %v607_v9 = vld [vmem:[%s1454_s6] ss:$0 sm:$0xff] }
  0x27   :  { %298 = vmatprep.mubr.f32.mxu1 %v32_v26  ;;  %967 = vmatpush3.bf16.msra.mxu1 %v964_v20 }
  0x28   :  { %772 = vmatmul.mubr.f32.gmra.mrb[2].mxu0 %v103_v27  ;;  %969 = vmatprep.subr.bf16.mxu1 %v968_v32 }
  0x29   :  { %939 = vmatpush3.bf16.msra.mxu0 %v936_v18  ;;  %774 = vmatprep.mubr.f32.mxu0 %v104_v29  ;;  %v474_v18 = vld [vmem:[%s1451_s5 + $0x60] sm:$0xff] }
  0x2a   :  { %941 = vmatprep.subr.bf16.mxu0 %v940_v28  ;;  %299 = vmatmul.mubr.f32.gmra.mrb[2].mxu1 %v31_v33  ;;  %v988_v20 = vpack.c.bf16 %v475_v19, %v474_v18 }
  0x2b   :  { %303 = vmatprep.mubr.f32.mxu1 %v35_v34  ;;  %971 = vmatpush3.bf16.msra.mxu1 %v968_v32 }
  0x2c   :  { %775 = vmatmul.mubr.f32.gmra.mrb[4].mxu0 %v105_v35  ;;  %973 = vmatprep.subr.bf16.mxu1 %v972_v8 }
  0x2d   :  { %943 = vmatpush3.bf16.msra.mxu0 %v940_v28  ;;  %777 = vmatprep.mubr.f32.mxu0 %v106_v37 }
  0x2e   :  { %945 = vmatprep.subr.bf16.mxu0 %v944_v36  ;;  %304 = vmatmul.mubr.f32.gmra.mrb[4].mxu1 %v34_v40 }
  0x2f   :  { %308 = vmatprep.mubr.f32.mxu1 %v38_v41  ;;  %975 = vmatpush3.bf16.msra.mxu1 %v972_v8 }
  0x30   :  { %778 = vmatmul.mubr.f32.gmra.mrb[6].mxu0 %v107_v42  ;;  %977 = vmatprep.subr.bf16.mxu1 %v976_v11 }
  0x31   :  { %947 = vmatpush3.bf16.msra.mxu0 %v944_v36  ;;  %812 = vmatprep.mubr.f32.mxu0 %v30_v44 }
  0x32   :  { %949 = vmatprep.subr.bf16.mxu0 %v948_v43  ;;  %309 = vmatmul.mubr.f32.gmra.mrb[6].mxu1 %v37_v47  ;;  %v606_v47 = vld [vmem:[%s1452_s4] ss:$0 sm:$0xff] }
  0x33   :  { %313 = vmatprep.mubr.f32.mxu1 %v41_v48  ;;  %979 = vmatpush3.bf16.msra.mxu1 %v976_v11 }
  0x34   :  { %981 = vmatprep.subr.bf16.mxu1 %v980_v14 }
  0x35   :  { %951 = vmatpush3.bf16.msra.mxu0 %v948_v43 }
  0x36   :  { %953 = vmatprep.subr.bf16.mxu0 %v952_v49  ;;  %314 = vmatmul.mubr.f32.gmra.mrb[8].mxu1 %v40_v52 }
  0x37   :  { %318 = vmatprep.mubr.f32.mxu1 %v44_v53  ;;  %983 = vmatpush3.bf16.msra.mxu1 %v980_v14 }
  0x38   :  { %985 = vmatprep.subr.bf16.mxu1 %v984_v17 }
  0x39   :  { %955 = vmatpush3.bf16.msra.mxu0 %v952_v49 }
  0x3a   :  { %957 = vmatprep.subr.bf16.mxu0 %v956_v54  ;;  %319 = vmatmul.mubr.f32.gmra.mrb[10].mxu1 %v43_v57 }
  0x3b   :  { %323 = vmatprep.mubr.f32.mxu1 %v47_v58  ;;  %987 = vmatpush3.bf16.msra.mxu1 %v984_v17 }
  0x3c   :  { %989 = vmatprep.subr.bf16.mxu1 %v988_v20 }
  0x3d   :  { %959 = vmatpush3.bf16.msra.mxu0 %v956_v54 }
  0x3e   :  { %961 = vmatprep.subr.bf16.mxu0 %v960_v59  ;;  %324 = vmatmul.mubr.f32.gmra.mrb[12].mxu1 %v46_v60 }
  0x3f   :  { %328 = vmatprep.mubr.f32.mxu1 %v50_v61  ;;  %991 = vmatpush3.bf16.msra.mxu1 %v988_v20 }
  0x40   :  { %993 = vmatprep.subr.bf16.mxu1 %v992_v23 }
  0x41   :  { %963 = vmatpush3.bf16.msra.mxu0 %v960_v59 }
  0x42   :  { %329 = vmatmul.mubr.f32.gmra.mrb[14].mxu1 %v49_v62 }
  0x43   :  { %995 = vmatpush3.bf16.msra.mxu1 %v992_v23 }
  0x44   :  { %813 = vmatmul.mubr.f32.vlgmr.msra.gmra.mrb[0].mxu0 %v33_v63 }
  0x45   :  { %815 = vmatprep.mubr.f32.mxu0 %v36_v0 }
  0x48   :  { %816 = vmatmul.mubr.f32.gmra.mrb[2].mxu0 %v39_v1 }
  0x49   :  { %818 = vmatprep.mubr.f32.mxu0 %v42_v2 }
  0x4c   :  { %819 = vmatmul.mubr.f32.gmra.mrb[4].mxu0 %v45_v3 }
  0x4d   :  { %821 = vmatprep.mubr.f32.mxu0 %v48_v4 }
  0x50   :  { %822 = vmatmul.mubr.f32.gmra.mrb[6].mxu0 %v51_v5 }
  0xf9   :  { %v664_v24 = vpop.f32.mrb[0].mxu1 }
  0xfa   :  { %v665_v25 = vpop.f32.mrb[1].mxu1 }
  0xfb   :  { %v666_v26 = vadd.f32 %v665_v25, %v664_v24 }
  0xfd   :  { %v667_v27 = vpop.f32.mrb[2].mxu1 }
  0xfe   :  { %v668_v28 = vpop.f32.mrb[3].mxu1 }
  0xff   :  { %v669_v29 = vadd.f32 %v668_v28, %v667_v27 }
 0x101   :  { %v670_v30 = vpop.f32.mrb[4].mxu1 }
 0x102   :  { %v671_v31 = vpop.f32.mrb[5].mxu1 }
 0x103   :  { %v672_v32 = vadd.f32 %v671_v31, %v670_v30 }
 0x105   :  { %v673_v33 = vpop.f32.mrb[6].mxu1 }
 0x106   :  { %v674_v34 = vpop.f32.mrb[7].mxu1 }
 0x107   :  { %v675_v35 = vadd.f32 %v674_v34, %v673_v33 }
 0x109   :  { %v676_v36 = vpop.f32.mrb[8].mxu1 }
 0x10a   :  { %v677_v37 = vpop.f32.mrb[9].mxu1 }
 0x10b   :  { %v678_v38 = vadd.f32 %v677_v37, %v676_v36 }
 0x10d   :  { %v679_v39 = vpop.f32.mrb[10].mxu1 }
 0x10e   :  { %v680_v40 = vpop.f32.mrb[11].mxu1 }
 0x10f   :  { %v681_v41 = vadd.f32 %v680_v40, %v679_v39 }
 0x111   :  { %v682_v42 = vpop.f32.mrb[12].mxu1 }
 0x112   :  { %v683_v43 = vpop.f32.mrb[13].mxu1 }
 0x113   :  { %v684_v44 = vadd.f32 %v683_v43, %v682_v42 }
 0x115   :  { %v685_v45 = vpop.f32.mrb[14].mxu1 }
 0x116   :  { %v686_v48 = vpop.f32.mrb[15].mxu1 }
 0x117   :  { %v814_v46 = vpop.f32.mrb[0].mxu0  ;;  %v687_v51 = vadd.f32 %v686_v48, %v685_v45 }
 0x118   :  { %v996_v49 = vadd.f32 %v814_v46, %v669_v29  ;;  %v400_v50 = vpop.f32.mrb[1].mxu0 }
 0x119   :  { %v997_v52 = vadd.f32 %v666_v26, %v400_v50 }
 0x11a   :  { %v447_v53 = vadd.f32 %v996_v49, %v606_v47 }
 0x11b   :  { %v446_v54 = vadd.f32 %v997_v52, %v606_v47  ;;  %v817_v55 = vpop.f32.mrb[2].mxu0 }
 0x11c   :  { %455 = vst [vmem:[%s1453_s7 + $0x8] sm:$0xff] %v447_v53  ;;  %v998_v56 = vadd.f32 %v817_v55, %v675_v35  ;;  %v410_v57 = vpop.f32.mrb[3].mxu0 }
 0x11d   :  { %454 = vst [vmem:[%s1453_s7] sm:$0xff] %v446_v54  ;;  %v999_v58 = vadd.f32 %v672_v32, %v410_v57  ;;  %856 = vmatprep.mubr.f32.mxu1 %v446_v54 }
 0x11e   :  { %v449_v59 = vadd.f32 %v998_v56, %v606_v47  ;;  %857 = vmatmul.mubr.f32.vlgmr.msra.gmra.mrb[16].mxu1 %v447_v53 }
 0x11f   :  { %v448_v60 = vadd.f32 %v999_v58, %v606_v47  ;;  %v820_v61 = vpop.f32.mrb[4].mxu0 }
 0x120   :  { %457 = vst [vmem:[%s1453_s7 + $0x18] sm:$0xff] %v449_v59  ;;  %v1000_v62 = vadd.f32 %v820_v61, %v681_v41  ;;  %v420_v63 = vpop.f32.mrb[5].mxu0 }
 0x121   :  { %456 = vst [vmem:[%s1453_s7 + $0x10] sm:$0xff] %v448_v60  ;;  %v1001_v0 = vadd.f32 %v678_v38, %v420_v63  ;;  %859 = vmatprep.mubr.f32.mxu1 %v448_v60 }
 0x122   :  { %v451_v1 = vadd.f32 %v1000_v62, %v606_v47  ;;  %860 = vmatmul.mubr.f32.gmra.mrb[18].mxu1 %v449_v59 }
 0x123   :  { %v450_v2 = vadd.f32 %v1001_v0, %v606_v47  ;;  %v823_v3 = vpop.f32.mrb[6].mxu0 }
 0x124   :  { %459 = vst [vmem:[%s1453_s7 + $0x28] sm:$0xff] %v451_v1  ;;  %v1002_v4 = vadd.f32 %v823_v3, %v687_v51  ;;  %v430_v5 = vpop.f32.mrb[7].mxu0 }
 0x125   :  { %458 = vst [vmem:[%s1453_s7 + $0x20] sm:$0xff] %v450_v2  ;;  %v1003_v6 = vadd.f32 %v684_v44, %v430_v5  ;;  %862 = vmatprep.mubr.f32.mxu1 %v450_v2 }
 0x126   :  { %v453_v7 = vadd.f32 %v1002_v4, %v606_v47  ;;  %863 = vmatmul.mubr.f32.gmra.mrb[20].mxu1 %v451_v1 }
 0x127   :  { %v452_v8 = vadd.f32 %v1003_v6, %v606_v47 }
 0x128   :  { %461 = vst [vmem:[%s1453_s7 + $0x38] sm:$0xff] %v453_v7 }
 0x129   :  { %460 = vst [vmem:[%s1453_s7 + $0x30] sm:$0xff] %v452_v8  ;;  %865 = vmatprep.mubr.f32.mxu1 %v452_v8 }
 0x12a   :  { %866 = vmatmul.mubr.f32.gmra.mrb[22].mxu1 %v453_v7 }
 0x1f1   :  { %v858_v10 = vpop.f32.mrb[16].mxu1 }
 0x1f2   :  { %v557_v11 = vadd.f32 %v858_v10, %v607_v9  ;;  %v551_v12 = vpop.f32.mrb[17].mxu1 }
 0x1f3   :  { %v552_v13 = vadd.f32 %v607_v9, %v551_v12 }
 0x1f4   :  { %591 = vst [vmem:[%s1455_s8 + $0x8] sm:$0xff] %v557_v11 }
 0x1f5   :  { %590 = vst [vmem:[%s1455_s8] sm:$0xff] %v552_v13  ;;  %v861_v14 = vpop.f32.mrb[18].mxu1 }
 0x1f6   :  { %v567_v15 = vadd.f32 %v861_v14, %v607_v9  ;;  %v561_v16 = vpop.f32.mrb[19].mxu1 }
 0x1f7   :  { %v562_v17 = vadd.f32 %v607_v9, %v561_v16 }
 0x1f8   :  { %593 = vst [vmem:[%s1455_s8 + $0x18] sm:$0xff] %v567_v15 }
 0x1f9   :  { %592 = vst [vmem:[%s1455_s8 + $0x10] sm:$0xff] %v562_v17  ;;  %v864_v18 = vpop.f32.mrb[20].mxu1 }
 0x1fa   :  { %v577_v19 = vadd.f32 %v864_v18, %v607_v9  ;;  %v571_v20 = vpop.f32.mrb[21].mxu1 }
 0x1fb   :  { %v572_v21 = vadd.f32 %v607_v9, %v571_v20 }
 0x1fc   :  { %595 = vst [vmem:[%s1455_s8 + $0x28] sm:$0xff] %v577_v19 }
 0x1fd   :  { %594 = vst [vmem:[%s1455_s8 + $0x20] sm:$0xff] %v572_v21  ;;  %v867_v22 = vpop.f32.mrb[22].mxu1 }
 0x1fe   :  { %v587_v23 = vadd.f32 %v867_v22, %v607_v9  ;;  %v581_v24 = vpop.f32.mrb[23].mxu1 }
 0x1ff   :  { %v582_v25 = vadd.f32 %v607_v9, %v581_v24 }
 0x200   :  { %597 = vst [vmem:[%s1455_s8 + $0x38] sm:$0xff] %v587_v23 }
 0x201   :  { %596 = vst [vmem:[%s1455_s8 + $0x30] sm:$0xff] %v582_v25 }

</bundles_post_ra>
